<compile_context>
chip_gen: v7x
topology: tpu7x:2x2x1
jax: 0.10.0
libtpu: 0.0.40
codegen_flags: <defaults>
</compile_context>

<pallas_src>
import functools

import jax
import jax.numpy as jnp
from jax.experimental import pallas as pl
from jax.experimental.pallas import tpu as pltpu


# --------------------------- hardware-aware config -------------------------- #

def _vmem_capacity_bytes():
    try:
        cap = getattr(pltpu.get_tpu_info(), "vmem_capacity_bytes", None)
        if cap:
            return int(cap)
    except Exception:
        pass
    return 64 * 1024 * 1024  # conservative default (v7x physical VMEM)


def _hw_config():
    cap = _vmem_capacity_bytes()
    if cap >= 100 * 1024 * 1024:       # v5e / v6e: 128 MiB VMEM
        return {"capacity": cap, "vmem_limit": 100 * 1024 * 1024,
                "tile_m": 512, "tile_k": 2048}
    # v7x (64 MiB physical) or unknown: stay conservative.
    return {"capacity": cap, "vmem_limit": 48 * 1024 * 1024,
            "tile_m": 256, "tile_k": 1024}


# ------------------------------ small helpers ------------------------------- #

def _round_up(n, m):
    return ((n + m - 1) // m) * m


def _pad_to(arr, rows=None, cols=None):
    r = 0 if rows is None else rows - arr.shape[0]
    c = 0 if cols is None else cols - arr.shape[1]
    if r == 0 and c == 0:
        return arr
    return jnp.pad(arr, ((0, r), (0, c)))


def _largest_tile(dim, max_tile):
    """Largest tile <= max_tile (power-of-2 steps, floor 128) dividing dim."""
    t = max_tile
    while t > 128 and dim % t != 0:
        t //= 2
    return t  # dim is always a multiple of 128, so t=128 always divides


# ------------------------------ Pallas kernels ------------------------------ #

def _fused_gcn_kernel(a_ref, xw1_ref, b1_ref, w2_ref, b2_ref, o_ref):
    """Both GCN layers in one kernel; A read from HBM exactly once."""
    a = a_ref[...]                                               # (Np, Np) bf16
    # Layer 1 propagation: H = relu(A @ (X W1) + b1); lane-dense C1p columns.
    h = jnp.dot(a, xw1_ref[...], preferred_element_type=jnp.float32)
    h = jnp.maximum(h + b1_ref[...], 0.0).astype(jnp.bfloat16)
    # Layer 2 feature transform: K = C1p = 128, clean MXU contraction.
    hw2 = jnp.dot(h, w2_ref[...],
                  preferred_element_type=jnp.float32).astype(jnp.bfloat16)
    # Layer 2 propagation reuses the SAME resident A.
    o = jnp.dot(a, hw2, preferred_element_type=jnp.float32) + b2_ref[...]
    o_ref[...] = o.astype(o_ref.dtype)


def _propagate_kernel(a_ref, xw_ref, b_ref, o_ref, acc_ref, *, apply_relu):
    """One streamed GCN propagation: act(A @ XW + b), K-tiled with accumulator."""
    kk = pl.program_id(1)

    @pl.when(kk == 0)
    def _():
        acc_ref[...] = jnp.zeros_like(acc_ref)

    acc_ref[...] += jnp.dot(a_ref[...], xw_ref[...],
                            preferred_element_type=jnp.float32)

    @pl.when(kk == pl.num_programs(1) - 1)
    def _():
        out = acc_ref[...] + b_ref[...]
        if apply_relu:
            out = jnp.maximum(out, 0.0)
        o_ref[...] = out.astype(o_ref.dtype)


def _propagate_streamed(a_pad, xw_pad, b_pad, *, apply_relu, out_dtype, cfg):
    """Large-graph fallback: A streamed as (tm, tk) tiles, XW keyed on k."""
    np_ = a_pad.shape[0]
    c_out = xw_pad.shape[1]
    tm = _largest_tile(np_, cfg["tile_m"])
    tk = _largest_tile(np_, cfg["tile_k"])
    grid = (np_ // tm, np_ // tk)

    flops = 2 * np_ * np_ * c_out
    bytes_accessed = (a_pad.size * a_pad.dtype.itemsize
                      + xw_pad.size * xw_pad.dtype.itemsize * grid[0]
                      + b_pad.size * 4
                      + np_ * c_out * jnp.dtype(out_dtype).itemsize)

    return pl.pallas_call(
        functools.partial(_propagate_kernel, apply_relu=apply_relu),
        out_shape=jax.ShapeDtypeStruct((np_, c_out), out_dtype),
        grid_spec=pltpu.PrefetchScalarGridSpec(
            num_scalar_prefetch=0,
            grid=grid,
            in_specs=[
                pl.BlockSpec((tm, tk), lambda i, k: (i, k)),     # A: streamed tiles
                pl.BlockSpec((tk, c_out), lambda i, k: (k, 0)),  # XW: keyed on k
                pl.BlockSpec((1, c_out), lambda i, k: (0, 0)),   # bias: resident
            ],
            out_specs=pl.BlockSpec((tm, c_out), lambda i, k: (i, 0)),
            scratch_shapes=[pltpu.VMEM((tm, c_out), jnp.float32)],
        ),
        compiler_params=pltpu.CompilerParams(
            dimension_semantics=("parallel", "arbitrary"),
            vmem_limit_bytes=cfg["vmem_limit"],
        ),
        cost_estimate=pl.CostEstimate(flops=int(flops), transcendentals=0,
                                      bytes_accessed=int(bytes_accessed)),
    )(a_pad, xw_pad, b_pad)


# ------------------------------ JAX wrapper --------------------------------- #

def simple_gnn_pallas(a_norm, x, w1, b1, w2, b2):
    """Two-layer GCN forward: relu(A@(X@W1)+b1) -> A@(H@W2)+b2."""
    cfg = _hw_config()
    num_nodes = x.shape[0]
    hidden = w1.shape[1]
    out_channels = w2.shape[1]

    # Pad node count to a lane multiple (full-lane A loads for small graphs and
    # exact K-tile division for the streamed path); pad channel dims to 128 so
    # every activation store is lane-dense.
    np_ = _round_up(num_nodes, 128)
    c1p = _round_up(hidden, 128)
    c2p = _round_up(out_channels, 128)

    a_bf = a_norm if a_norm.dtype == jnp.bfloat16 else a_norm.astype(jnp.bfloat16)
    a_pad = _pad_to(a_bf, rows=np_, cols=np_)

    x_pad = _pad_to(x.astype(jnp.bfloat16), rows=np_)
    w1_p = _pad_to(w1.astype(jnp.bfloat16), cols=c1p)
    b1_p = _pad_to(b1.astype(jnp.float32), cols=c1p)
    w2_p = _pad_to(w2.astype(jnp.bfloat16), rows=c1p, cols=c2p)
    b2_p = _pad_to(b2.astype(jnp.float32), cols=c2p)

    # Feature transform hoisted out of the propagation kernels (computed once).
    xw1 = jnp.dot(x_pad, w1_p,
                  preferred_element_type=jnp.float32).astype(jnp.bfloat16)

    # Rough resident-footprint estimate for the fused single-kernel path.
    fused_bytes = (
        a_pad.size * 2                       # A resident (bf16)
        + xw1.size * 2                       # XW1
        + np_ * c1p * (4 + 2)                # H f32 temp + bf16
        + np_ * c2p * (2 + 4 + 4)            # HW2 bf16 + f32 acc + f32 out
        + w2_p.size * 2 + c1p * 4 + c2p * 4  # weights / biases
    )

    if fused_bytes <= int(0.4 * cfg["capacity"]):
        # Fused path: both layers in one pallas_call, A read from HBM once.
        flops = 2 * np_ * np_ * c1p + 2 * np_ * c1p * c2p + 2 * np_ * np_ * c2p
        bytes_accessed = (a_pad.size * 2 + xw1.size * 2 + w2_p.size * 2
                          + b1_p.size * 4 + b2_p.size * 4 + np_ * c2p * 4)
        o = pl.pallas_call(
            _fused_gcn_kernel,
            out_shape=jax.ShapeDtypeStruct((np_, c2p), jnp.float32),
            compiler_params=pltpu.CompilerParams(
                vmem_limit_bytes=cfg["vmem_limit"]),
            cost_estimate=pl.CostEstimate(flops=int(flops), transcendentals=0,
                                          bytes_accessed=int(bytes_accessed)),
        )(a_pad, xw1, b1_p, w2_p, b2_p)
    else:
        # Large-graph fallback: one streamed, K-tiled pallas_call per layer;
        # the (small) H@W2 transform stays a plain XLA matmul between them.
        h = _propagate_streamed(a_pad, xw1, b1_p, apply_relu=True,
                                out_dtype=jnp.bfloat16, cfg=cfg)
        hw2 = jnp.dot(h, w2_p,
                      preferred_element_type=jnp.float32).astype(jnp.bfloat16)
        o = _propagate_streamed(a_pad, hw2, b2_p, apply_relu=False,
                                out_dtype=jnp.float32, cfg=cfg)

    return o[:num_nodes, :out_channels]


# --------------------------- graph / param helpers -------------------------- #

def build_normalized_adjacency(edge_index, num_nodes, dtype=jnp.bfloat16):
    """Dense D^{-1/2}(A+I)D^{-1/2} with A[target, source]; materialized once in bf16."""
    src = edge_index[0]
    tgt = edge_index[1]
    loop = jnp.arange(num_nodes, dtype=edge_index.dtype)
    src = jnp.concatenate([src, loop])
    tgt = jnp.concatenate([tgt, loop])
    a = jnp.zeros((num_nodes, num_nodes), jnp.float32).at[tgt, src].add(1.0)
    deg = a.sum(axis=1)                      # in-degree incl. self loop
    dinv = jnp.where(deg > 0, 1.0 / jnp.sqrt(deg), 0.0)
    return (dinv[:, None] * a * dinv[None, :]).astype(dtype)


def init_params(key, in_channels, hidden_channels, out_channels):
    k1, k2 = jax.random.split(key)

    def glorot(k, fan_in, fan_out):
        lim = jnp.sqrt(6.0 / (fan_in + fan_out))
        return jax.random.uniform(k, (fan_in, fan_out), jnp.float32, -lim, lim)

    w1 = glorot(k1, in_channels, hidden_channels)
    b1 = jnp.zeros((1, hidden_channels), jnp.float32)
    w2 = glorot(k2, hidden_channels, out_channels)
    b2 = jnp.zeros((1, out_channels), jnp.float32)
    return w1, b1, w2, b2


def reference_forward(a_norm, x, w1, b1, w2, b2):
    h = jnp.maximum(a_norm @ (x @ w1) + b1, 0.0)
    return a_norm @ (h @ w2) + b2


# ------------------------------ main ---------------------------------------- #

if __name__ == "__main__":
    num_nodes = 64
    num_edges = 128
    in_channels, hidden_channels, out_channels = 16, 32, 8

    key = jax.random.PRNGKey(0)
    kx, ke, kp = jax.random.split(key, 3)

    x = jax.random.normal(kx, (num_nodes, in_channels), jnp.float32)
    edge_index = jax.random.randint(ke, (2, num_edges), 0, num_nodes, jnp.int32)

    w1, b1, w2, b2 = init_params(kp, in_channels, hidden_channels, out_channels)
    a_norm = build_normalized_adjacency(edge_index, num_nodes)   # bf16, built once

    fwd = jax.jit(simple_gnn_pallas)
    out = fwd(a_norm, x, w1, b1, w2, b2)
    out = jax.block_until_ready(out)

    ref = reference_forward(a_norm.astype(jnp.float32), x, w1, b1, w2, b2)
    assert out.shape == (num_nodes, out_channels)
    assert out.dtype == jnp.float32
    max_err = float(jnp.max(jnp.abs(out - ref)))
    # bf16 operands with f32 accumulation -> loosened tolerance vs. the f32 reference.
    assert jnp.allclose(out, ref, atol=3e-2, rtol=3e-2), f"max abs err {max_err}"

    print("KERNEL_OK")
</pallas_src>

<mosaic_0001>
module attributes {stable_mosaic.version = 11 : i64} {
  func.func @_fused_gcn_kernel(%arg0: memref<128x128xbf16, #tpu.memory_space<vmem>>, %arg1: memref<128x128xbf16, #tpu.memory_space<vmem>>, %arg2: memref<1x128xf32, #tpu.memory_space<vmem>>, %arg3: memref<128x128xbf16, #tpu.memory_space<vmem>>, %arg4: memref<1x128xf32, #tpu.memory_space<vmem>>, %arg5: memref<128x128xf32, #tpu.memory_space<vmem>>) attributes {dimension_semantics = [], scalar_prefetch = 0 : i64, scratch_operands = 0 : i64, tpu.core_type = #tpu.core_type<tc>} {
    %c0 = arith.constant 0 : index
    %c0_0 = arith.constant 0 : index
    %0 = vector.load %arg0[%c0, %c0_0] : memref<128x128xbf16, #tpu.memory_space<vmem>>, vector<128x128xbf16>
    %c0_1 = arith.constant 0 : index
    %c0_2 = arith.constant 0 : index
    %1 = vector.load %arg1[%c0_1, %c0_2] : memref<128x128xbf16, #tpu.memory_space<vmem>>, vector<128x128xbf16>
    %cst = arith.constant dense<0.000000e+00> : vector<128x128xf32>
    %2 = tpu.matmul %0, %1, %cst {dimension_numbers = #tpu.dot_dimension_numbers<[1], [0], [0], [1], [0, 0, 1, 1], [], []>} : vector<128x128xbf16>, vector<128x128xbf16>, vector<128x128xf32> -> vector<128x128xf32>
    %c0_3 = arith.constant 0 : index
    %c0_4 = arith.constant 0 : index
    %3 = vector.load %arg2[%c0_3, %c0_4] : memref<1x128xf32, #tpu.memory_space<vmem>>, vector<1x128xf32>
    %4 = vector.broadcast %3 : vector<1x128xf32> to vector<128x128xf32>
    %5 = arith.addf %2, %4 : vector<128x128xf32>
    %cst_5 = arith.constant 0.000000e+00 : f32
    %6 = vector.broadcast %cst_5 : f32 to vector<128x128xf32>
    %7 = arith.maximumf %5, %6 : vector<128x128xf32>
    %8 = arith.truncf %7 : vector<128x128xf32> to vector<128x128xbf16>
    %c0_6 = arith.constant 0 : index
    %c0_7 = arith.constant 0 : index
    %9 = vector.load %arg3[%c0_6, %c0_7] : memref<128x128xbf16, #tpu.memory_space<vmem>>, vector<128x128xbf16>
    %cst_8 = arith.constant dense<0.000000e+00> : vector<128x128xf32>
    %10 = tpu.matmul %8, %9, %cst_8 {dimension_numbers = #tpu.dot_dimension_numbers<[1], [0], [0], [1], [0, 0, 1, 1], [], []>} : vector<128x128xbf16>, vector<128x128xbf16>, vector<128x128xf32> -> vector<128x128xf32>
    %11 = arith.truncf %10 : vector<128x128xf32> to vector<128x128xbf16>
    %cst_9 = arith.constant dense<0.000000e+00> : vector<128x128xf32>
    %12 = tpu.matmul %0, %11, %cst_9 {dimension_numbers = #tpu.dot_dimension_numbers<[1], [0], [0], [1], [0, 0, 1, 1], [], []>} : vector<128x128xbf16>, vector<128x128xbf16>, vector<128x128xf32> -> vector<128x128xf32>
    %c0_10 = arith.constant 0 : index
    %c0_11 = arith.constant 0 : index
    %13 = vector.load %arg4[%c0_10, %c0_11] : memref<1x128xf32, #tpu.memory_space<vmem>>, vector<1x128xf32>
    %14 = vector.broadcast %13 : vector<1x128xf32> to vector<128x128xf32>
    %15 = arith.addf %12, %14 : vector<128x128xf32>
    %c0_12 = arith.constant 0 : index
    %c0_13 = arith.constant 0 : index
    %16 = vector.load %arg5[%c0_12, %c0_13] : memref<128x128xf32, #tpu.memory_space<vmem>>, vector<128x128xf32>
    tpu.vector_store %arg5[%c0_12, %c0_13], %15 {strides = array<i32>} : memref<128x128xf32, #tpu.memory_space<vmem>>, vector<128x128xf32>,
    return
  }
}

</mosaic_0001>

<bundles_post_ra>
// kernel: simple_gnn_pallas.1
= control target key start
LH: loop header
LB: loop body
LE: loop exit
PB: predicated region body
PF: predicated region fallthrough
CT: control target
= control target key end

     0   :  { %s964_s1 = inlined_call_operand.vmem [shape: bf16[128,128], index: 1, kind: input, shape index: {}]   ;;  %s965_s0 = inlined_call_operand.vmem [shape: bf16[128,128], index: 0, kind: input, shape index: {}]   ;;  %s966_s3 = inlined_call_operand.vmem [shape: bf16[128,128], index: 3, kind: input, shape index: {}]   ;;  %s967_s2 = inlined_call_operand.vmem [shape: f32[1,128], index: 2, kind: input, shape index: {}]   ;;  %s968_s4 = inlined_call_operand.vmem [shape: f32[1,128], index: 4, kind: input, shape index: {}]   ;;  %s969_s5 = inlined_call_operand.vmem [shape: f32[128,128], index: 5, kind: output, shape index: {}]  }
   0x1   :  { %v756_v0 = vld [vmem:[%s964_s1] sm:$0xff]   ;;  %v757_v1 = vld [vmem:[%s964_s1 + $0x8] sm:$0xff]   ;;  %v758_v2 = vld [vmem:[%s964_s1 + $0x10] sm:$0xff]  }
   0x2   :  { %644 = vmatprep.subr.bf16.mxu0 %v756_v0  ;;  %v759_v3 = vld [vmem:[%s964_s1 + $0x18] sm:$0xff]   ;;  %v764_v4 = vld [vmem:[%s965_s0] sm:$0xff]   ;;  %v761_v6 = vld [vmem:[%s964_s1 + $0x28] sm:$0xff]  }
   0x3   :  { %645 = vmatpush3.bf16.msra.mxu0 %v756_v0  ;;  %660 = vmatprep.mubr.bf16.mxu0 %v764_v4  ;;  %v760_v5 = vld [vmem:[%s964_s1 + $0x20] sm:$0xff]   ;;  %v773_v8 = vld [vmem:[%s966_s3 + $0x8] sm:$0xff]   ;;  %v762_v9 = vld [vmem:[%s964_s1 + $0x30] sm:$0xff]  }
   0x4   :  { %646 = vmatprep.subr.bf16.mxu0 %v757_v1  ;;  %v772_v7 = vld [vmem:[%s966_s3] sm:$0xff]   ;;  %v774_v10 = vld [vmem:[%s966_s3 + $0x10] sm:$0xff]   ;;  %v763_v11 = vld [vmem:[%s964_s1 + $0x38] sm:$0xff]  }
   0x5   :  { %676 = vmatprep.subr.bf16.mxu1 %v772_v7  ;;  %v775_v12 = vld [vmem:[%s966_s3 + $0x18] sm:$0xff]   ;;  %v776_v13 = vld [vmem:[%s966_s3 + $0x20] sm:$0xff]   ;;  %v855_v14 = vld [vmem:[%s965_s0 + $0x8] sm:$0xff]  }
   0x6   :  { %677 = vmatpush3.bf16.msra.mxu1 %v772_v7  ;;  %v860_v15 = vld [vmem:[%s965_s0 + $0x10] sm:$0xff]   ;;  %v777_v16 = vld [vmem:[%s966_s3 + $0x28] sm:$0xff]   ;;  %v870_v17 = vld [vmem:[%s965_s0 + $0x18] sm:$0xff]  }
   0x7   :  { %647 = vmatpush3.bf16.msra.mxu0 %v757_v1  ;;  %678 = vmatprep.subr.bf16.mxu1 %v773_v8  ;;  %v875_v18 = vld [vmem:[%s965_s0 + $0x20] sm:$0xff]   ;;  %v882_v19 = vld [vmem:[%s965_s0 + $0x28] sm:$0xff]   ;;  %v887_v20 = vld [vmem:[%s965_s0 + $0x30] sm:$0xff]  }
   0x8   :  { %648 = vmatprep.subr.bf16.mxu0 %v758_v2  ;;  %v894_v21 = vld [vmem:[%s965_s0 + $0x38] sm:$0xff]   ;;  %v778_v22 = vld [vmem:[%s966_s3 + $0x30] sm:$0xff]   ;;  %v570_v24 = vld [vmem:[%s967_s2] ss:$0 sm:$0xff] }
   0x9   :  { %v779_v23 = vld [vmem:[%s966_s3 + $0x38] sm:$0xff]  }
   0xa   :  { %679 = vmatpush3.bf16.msra.mxu1 %v773_v8 }
   0xb   :  { %649 = vmatpush3.bf16.msra.mxu0 %v758_v2  ;;  %680 = vmatprep.subr.bf16.mxu1 %v774_v10 }
   0xc   :  { %650 = vmatprep.subr.bf16.mxu0 %v759_v3 }
   0xe   :  { %681 = vmatpush3.bf16.msra.mxu1 %v774_v10 }
   0xf   :  { %651 = vmatpush3.bf16.msra.mxu0 %v759_v3  ;;  %682 = vmatprep.subr.bf16.mxu1 %v775_v12 }
  0x10   :  { %652 = vmatprep.subr.bf16.mxu0 %v760_v5 }
  0x12   :  { %683 = vmatpush3.bf16.msra.mxu1 %v775_v12 }
  0x13   :  { %653 = vmatpush3.bf16.msra.mxu0 %v760_v5  ;;  %684 = vmatprep.subr.bf16.mxu1 %v776_v13 }
  0x14   :  { %654 = vmatprep.subr.bf16.mxu0 %v761_v6 }
  0x16   :  { %685 = vmatpush3.bf16.msra.mxu1 %v776_v13 }
  0x17   :  { %655 = vmatpush3.bf16.msra.mxu0 %v761_v6  ;;  %686 = vmatprep.subr.bf16.mxu1 %v777_v16 }
  0x18   :  { %656 = vmatprep.subr.bf16.mxu0 %v762_v9 }
  0x1a   :  { %687 = vmatpush3.bf16.msra.mxu1 %v777_v16 }
  0x1b   :  { %657 = vmatpush3.bf16.msra.mxu0 %v762_v9  ;;  %688 = vmatprep.subr.bf16.mxu1 %v778_v22 }
  0x1c   :  { %658 = vmatprep.subr.bf16.mxu0 %v763_v11 }
  0x1e   :  { %689 = vmatpush3.bf16.msra.mxu1 %v778_v22 }
  0x1f   :  { %659 = vmatpush3.bf16.msra.mxu0 %v763_v11  ;;  %690 = vmatprep.subr.bf16.mxu1 %v779_v23 }
  0x22   :  { %661 = vmatmul.mubr.bf16.vlgmr.msra.gmra.mrb[0].mxu0 %v855_v14  ;;  %691 = vmatpush3.bf16.msra.mxu1 %v779_v23 }
  0x23   :  { %664 = vmatprep.mubr.bf16.mxu0 %v860_v15 }
  0x2a   :  { %665 = vmatmul.mubr.bf16.gmra.mrb[4].mxu0 %v870_v17 }
  0x2b   :  { %668 = vmatprep.mubr.bf16.mxu0 %v875_v18 }
  0x32   :  { %669 = vmatmul.mubr.bf16.gmra.mrb[8].mxu0 %v882_v19 }
  0x33   :  { %672 = vmatprep.mubr.bf16.mxu0 %v887_v20 }
  0x3a   :  { %673 = vmatmul.mubr.bf16.gmra.mrb[12].mxu0 %v894_v21 }
  0x3b   :  { %724 = vmatprep.mubr.bf16.mxu0 %v764_v4 }
  0xf5   :  { %v662_v25 = vpop.f32.mrb[0].mxu0 }
  0xf6   :  { %v199_v26 = vadd.f32 %v662_v25, %v570_v24  ;;  %v190_v27 = vpop.f32.mrb[1].mxu0 }
  0xf7   :  { %v191_v28 = vadd.f32 %v570_v24, %v190_v27  ;;  %v663_v29 = vpop.f32.mrb[2].mxu0 }
  0xf8   :  { %v202_v30 = vadd.f32 %v663_v29, %v570_v24  ;;  %v193_v31 = vpop.f32.mrb[3].mxu0  ;;  %v255_v33 = vmax.f32 %v199_v26, 0.0 }
  0xf9   :  { %v194_v32 = vadd.f32 %v570_v24, %v193_v31  ;;  %v253_v35 = vmax.f32 %v191_v28, 0.0 }
  0xfa   :  { %v256_v34 = vmax.f32 %v202_v30, 0.0 }
  0xfb   :  { %v254_v36 = vmax.f32 %v194_v32, 0.0 }
  0xfc   :  { %v270_v37 = vpack.c.bf16 %v256_v34, %v255_v33 }
  0xfd   :  { %v666_v38 = vpop.f32.mrb[4].mxu0  ;;  %v269_v39 = vpack.c.bf16 %v254_v36, %v253_v35 }
  0xfe   :  { %v215_v40 = vadd.f32 %v666_v38, %v570_v24  ;;  %v206_v41 = vpop.f32.mrb[5].mxu0 }
  0xff   :  { %v207_v42 = vadd.f32 %v570_v24, %v206_v41  ;;  %v667_v43 = vpop.f32.mrb[6].mxu0  ;;  %692 = vmatprep.mubr.bf16.mxu1 %v269_v39 }
 0x100   :  { %v218_v44 = vadd.f32 %v667_v43, %v570_v24  ;;  %v209_v45 = vpop.f32.mrb[7].mxu0  ;;  %693 = vmatmul.mubr.bf16.vlgmr.msra.gmra.mrb[0].mxu1 %v270_v37  ;;  %v259_v47 = vmax.f32 %v215_v40, 0.0 }
 0x101   :  { %v210_v46 = vadd.f32 %v570_v24, %v209_v45  ;;  %v257_v49 = vmax.f32 %v207_v42, 0.0 }
 0x102   :  { %v260_v48 = vmax.f32 %v218_v44, 0.0 }
 0x103   :  { %v258_v50 = vmax.f32 %v210_v46, 0.0 }
 0x104   :  { %v272_v51 = vpack.c.bf16 %v260_v48, %v259_v47  ;;  %v595_v47 = vld [vmem:[%s968_s4] ss:$0 sm:$0xff] }
 0x105   :  { %v271_v52 = vpack.c.bf16 %v258_v50, %v257_v49  ;;  %v670_v53 = vpop.f32.mrb[8].mxu0 }
 0x106   :  { %v231_v54 = vadd.f32 %v670_v53, %v570_v24  ;;  %v222_v55 = vpop.f32.mrb[9].mxu0 }
 0x107   :  { %v223_v56 = vadd.f32 %v570_v24, %v222_v55  ;;  %v671_v57 = vpop.f32.mrb[10].mxu0  ;;  %696 = vmatprep.mubr.bf16.mxu1 %v271_v52 }
 0x108   :  { %v234_v58 = vadd.f32 %v671_v57, %v570_v24  ;;  %v225_v59 = vpop.f32.mrb[11].mxu0  ;;  %697 = vmatmul.mubr.bf16.gmra.mrb[4].mxu1 %v272_v51  ;;  %v263_v61 = vmax.f32 %v231_v54, 0.0 }
 0x109   :  { %v226_v60 = vadd.f32 %v570_v24, %v225_v59  ;;  %v261_v63 = vmax.f32 %v223_v56, 0.0 }
 0x10a   :  { %v264_v62 = vmax.f32 %v234_v58, 0.0 }
 0x10b   :  { %v262_v0 = vmax.f32 %v226_v60, 0.0 }
 0x10c   :  { %v274_v1 = vpack.c.bf16 %v264_v62, %v263_v61 }
 0x10d   :  { %v273_v2 = vpack.c.bf16 %v262_v0, %v261_v63  ;;  %v674_v3 = vpop.f32.mrb[12].mxu0 }
 0x10e   :  { %v247_v4 = vadd.f32 %v674_v3, %v570_v24  ;;  %v238_v5 = vpop.f32.mrb[13].mxu0 }
 0x10f   :  { %v239_v6 = vadd.f32 %v570_v24, %v238_v5  ;;  %v675_v7 = vpop.f32.mrb[14].mxu0  ;;  %700 = vmatprep.mubr.bf16.mxu1 %v273_v2 }
 0x110   :  { %v250_v8 = vadd.f32 %v675_v7, %v570_v24  ;;  %v241_v9 = vpop.f32.mrb[15].mxu0  ;;  %701 = vmatmul.mubr.bf16.gmra.mrb[8].mxu1 %v274_v1  ;;  %v267_v11 = vmax.f32 %v247_v4, 0.0 }
 0x111   :  { %v242_v10 = vadd.f32 %v570_v24, %v241_v9  ;;  %v265_v13 = vmax.f32 %v239_v6, 0.0 }
 0x112   :  { %v268_v12 = vmax.f32 %v250_v8, 0.0 }
 0x113   :  { %v266_v16 = vmax.f32 %v242_v10, 0.0 }
 0x114   :  { %v276_v22 = vpack.c.bf16 %v268_v12, %v267_v11 }
 0x115   :  { %v275_v23 = vpack.c.bf16 %v266_v16, %v265_v13 }
 0x117   :  { %704 = vmatprep.mubr.bf16.mxu1 %v275_v23 }
 0x118   :  { %705 = vmatmul.mubr.bf16.gmra.mrb[12].mxu1 %v276_v22 }
 0x119   :  { %732 = vmatprep.mubr.bf16.mxu1 %v875_v18 }
 0x1d3   :  { %v694_v25 = vpop.f32.mrb[0].mxu1 }
 0x1d4   :  { %v375_v26 = vpop.f32.mrb[1].mxu1 }
 0x1d5   :  { %v695_v27 = vpop.f32.mrb[2].mxu1 }
 0x1d6   :  { %v439_v28 = vpack.c.bf16 %v695_v27, %v694_v25  ;;  %v378_v29 = vpop.f32.mrb[3].mxu1 }
 0x1d7   :  { %v438_v30 = vpack.c.bf16 %v378_v29, %v375_v26 }
 0x1d9   :  { %708 = vmatprep.subr.bf16.mxu0 %v438_v30  ;;  %740 = vmatprep.subr.bf16.mxu1 %v438_v30 }
 0x1da   :  { %709 = vmatpush3.bf16.msra.mxu0 %v438_v30  ;;  %748 = vmatpush3.bf16.msra.mxu1 %v438_v30 }
 0x1db   :  { %v698_v24 = vpop.f32.mrb[4].mxu1  ;;  %710 = vmatprep.subr.bf16.mxu0 %v439_v28  ;;  %741 = vmatprep.subr.bf16.mxu1 %v439_v28 }
 0x1dc   :  { %v391_v31 = vpop.f32.mrb[5].mxu1 }
 0x1dd   :  { %v699_v32 = vpop.f32.mrb[6].mxu1 }
 0x1de   :  { %v441_v33 = vpack.c.bf16 %v699_v32, %v698_v24  ;;  %v394_v34 = vpop.f32.mrb[7].mxu1  ;;  %711 = vmatpush3.bf16.msra.mxu0 %v439_v28  ;;  %749 = vmatpush3.bf16.msra.mxu1 %v439_v28 }
 0x1df   :  { %v440_v18 = vpack.c.bf16 %v394_v34, %v391_v31 }
 0x1e1   :  { %712 = vmatprep.subr.bf16.mxu0 %v440_v18  ;;  %742 = vmatprep.subr.bf16.mxu1 %v440_v18 }
 0x1e2   :  { %713 = vmatpush3.bf16.msra.mxu0 %v440_v18  ;;  %750 = vmatpush3.bf16.msra.mxu1 %v440_v18 }
 0x1e3   :  { %v702_v35 = vpop.f32.mrb[8].mxu1  ;;  %714 = vmatprep.subr.bf16.mxu0 %v441_v33  ;;  %743 = vmatprep.subr.bf16.mxu1 %v441_v33 }
 0x1e4   :  { %v407_v36 = vpop.f32.mrb[9].mxu1 }
 0x1e5   :  { %v703_v37 = vpop.f32.mrb[10].mxu1 }
 0x1e6   :  { %v443_v38 = vpack.c.bf16 %v703_v37, %v702_v35  ;;  %v410_v39 = vpop.f32.mrb[11].mxu1  ;;  %715 = vmatpush3.bf16.msra.mxu0 %v441_v33  ;;  %751 = vmatpush3.bf16.msra.mxu1 %v441_v33 }
 0x1e7   :  { %v442_v40 = vpack.c.bf16 %v410_v39, %v407_v36 }
 0x1e9   :  { %716 = vmatprep.subr.bf16.mxu0 %v442_v40  ;;  %744 = vmatprep.subr.bf16.mxu1 %v442_v40 }
 0x1ea   :  { %717 = vmatpush3.bf16.msra.mxu0 %v442_v40  ;;  %752 = vmatpush3.bf16.msra.mxu1 %v442_v40 }
 0x1eb   :  { %v706_v41 = vpop.f32.mrb[12].mxu1  ;;  %718 = vmatprep.subr.bf16.mxu0 %v443_v38  ;;  %745 = vmatprep.subr.bf16.mxu1 %v443_v38 }
 0x1ec   :  { %v423_v42 = vpop.f32.mrb[13].mxu1 }
 0x1ed   :  { %v707_v43 = vpop.f32.mrb[14].mxu1 }
 0x1ee   :  { %v445_v44 = vpack.c.bf16 %v707_v43, %v706_v41  ;;  %v426_v45 = vpop.f32.mrb[15].mxu1  ;;  %719 = vmatpush3.bf16.msra.mxu0 %v443_v38  ;;  %753 = vmatpush3.bf16.msra.mxu1 %v443_v38 }
 0x1ef   :  { %v444_v46 = vpack.c.bf16 %v426_v45, %v423_v42 }
 0x1f1   :  { %720 = vmatprep.subr.bf16.mxu0 %v444_v46  ;;  %746 = vmatprep.subr.bf16.mxu1 %v444_v46 }
 0x1f2   :  { %721 = vmatpush3.bf16.msra.mxu0 %v444_v46  ;;  %754 = vmatpush3.bf16.msra.mxu1 %v444_v46 }
 0x1f3   :  { %722 = vmatprep.subr.bf16.mxu0 %v445_v44  ;;  %747 = vmatprep.subr.bf16.mxu1 %v445_v44 }
 0x1f6   :  { %723 = vmatpush3.bf16.msra.mxu0 %v445_v44  ;;  %755 = vmatpush3.bf16.msra.mxu1 %v445_v44 }
 0x1f9   :  { %725 = vmatmul.mubr.bf16.vlgmr.msra.gmra.mrb[16].mxu0 %v855_v14  ;;  %733 = vmatmul.mubr.bf16.vlgmr.msra.gmra.mrb[16].mxu1 %v882_v19 }
 0x1fa   :  { %728 = vmatprep.mubr.bf16.mxu0 %v860_v15  ;;  %736 = vmatprep.mubr.bf16.mxu1 %v887_v20 }
 0x201   :  { %729 = vmatmul.mubr.bf16.gmra.mrb[20].mxu0 %v870_v17  ;;  %737 = vmatmul.mubr.bf16.gmra.mrb[20].mxu1 %v894_v21 }
 0x2cc   :  { %v726_v48 = vpop.f32.mrb[16].mxu0  ;;  %v734_v49 = vpop.f32.mrb[16].mxu1 }
 0x2cd   :  { %v496_v50 = vadd.f32 %v726_v48, %v595_v47  ;;  %v528_v51 = vadd.f32 %v734_v49, %v595_v47  ;;  %v487_v52 = vpop.f32.mrb[17].mxu0  ;;  %v519_v14 = vpop.f32.mrb[17].mxu1 }
 0x2ce   :  { %v488_v53 = vadd.f32 %v595_v47, %v487_v52  ;;  %v520_v19 = vadd.f32 %v595_v47, %v519_v14  ;;  %v727_v54 = vpop.f32.mrb[18].mxu0  ;;  %v735_v15 = vpop.f32.mrb[18].mxu1 }
 0x2cf   :  { %552 = vst [vmem:[%s969_s5 + $0x10] sm:$0xff] %v496_v50  ;;  %560 = vst [vmem:[%s969_s5 + $0x50] sm:$0xff] %v528_v51  ;;  %v499_v17 = vadd.f32 %v727_v54, %v595_v47  ;;  %v531_v20 = vadd.f32 %v735_v15, %v595_v47  ;;  %v490_v21 = vpop.f32.mrb[19].mxu0  ;;  %v522_v55 = vpop.f32.mrb[19].mxu1 }
 0x2d0   :  { %550 = vst [vmem:[%s969_s5] sm:$0xff] %v488_v53  ;;  %558 = vst [vmem:[%s969_s5 + $0x40] sm:$0xff] %v520_v19  ;;  %v491_v56 = vadd.f32 %v595_v47, %v490_v21  ;;  %v523_v57 = vadd.f32 %v595_v47, %v522_v55 }
 0x2d1   :  { %553 = vst [vmem:[%s969_s5 + $0x18] sm:$0xff] %v499_v17  ;;  %561 = vst [vmem:[%s969_s5 + $0x58] sm:$0xff] %v531_v20 }
 0x2d2   :  { %551 = vst [vmem:[%s969_s5 + $0x8] sm:$0xff] %v491_v56  ;;  %559 = vst [vmem:[%s969_s5 + $0x48] sm:$0xff] %v523_v57 }
 0x2d4   :  { %v730_v58 = vpop.f32.mrb[20].mxu0  ;;  %v738_v59 = vpop.f32.mrb[20].mxu1 }
 0x2d5   :  { %v512_v60 = vadd.f32 %v730_v58, %v595_v47  ;;  %v544_v61 = vadd.f32 %v738_v59, %v595_v47  ;;  %v503_v62 = vpop.f32.mrb[21].mxu0  ;;  %v535_v63 = vpop.f32.mrb[21].mxu1 }
 0x2d6   :  { %v504_v0 = vadd.f32 %v595_v47, %v503_v62  ;;  %v536_v1 = vadd.f32 %v595_v47, %v535_v63  ;;  %v731_v2 = vpop.f32.mrb[22].mxu0  ;;  %v739_v3 = vpop.f32.mrb[22].mxu1 }
 0x2d7   :  { %556 = vst [vmem:[%s969_s5 + $0x30] sm:$0xff] %v512_v60  ;;  %564 = vst [vmem:[%s969_s5 + $0x70] sm:$0xff] %v544_v61  ;;  %v515_v4 = vadd.f32 %v731_v2, %v595_v47  ;;  %v547_v5 = vadd.f32 %v739_v3, %v595_v47  ;;  %v506_v6 = vpop.f32.mrb[23].mxu0  ;;  %v538_v7 = vpop.f32.mrb[23].mxu1 }
 0x2d8   :  { %554 = vst [vmem:[%s969_s5 + $0x20] sm:$0xff] %v504_v0  ;;  %562 = vst [vmem:[%s969_s5 + $0x60] sm:$0xff] %v536_v1  ;;  %v507_v8 = vadd.f32 %v595_v47, %v506_v6  ;;  %v539_v9 = vadd.f32 %v595_v47, %v538_v7 }
 0x2d9   :  { %557 = vst [vmem:[%s969_s5 + $0x38] sm:$0xff] %v515_v4  ;;  %565 = vst [vmem:[%s969_s5 + $0x78] sm:$0xff] %v547_v5 }
 0x2da   :  { %555 = vst [vmem:[%s969_s5 + $0x28] sm:$0xff] %v507_v8  ;;  %563 = vst [vmem:[%s969_s5 + $0x68] sm:$0xff] %v539_v9 }

</bundles_post_ra>
